<compile_context>
chip_gen: v6e
topology: v6e:2x2x1
jax: 0.10.0
libtpu: 0.0.40
codegen_flags: <defaults>
</compile_context>

<pallas_src>
from functools import partial

import jax
import jax.numpy as jnp
from jax.experimental import pallas as pl
from jax.experimental.pallas import tpu as pltpu


def _round_up(x, m):
    return (x + m - 1) // m * m


def _patch_embed_kernel(p_ref, w_ref, b_ref, o_ref):
    # p_ref: (TM, K_pad) patch row tile; w_ref: (K_pad, N_pad) projection;
    # b_ref: (1, N_pad) f32 bias.  MXU matmul with f32 accumulation.
    acc = jnp.dot(p_ref[...], w_ref[...], preferred_element_type=jnp.float32)
    o_ref[...] = (acc + b_ref[...]).astype(o_ref.dtype)


@partial(jax.jit, static_argnames=("patch_size", "compute_dtype", "out_dtype",
                                   "tm_target", "vmem_budget_bytes"))
def patch_embed(x, weight, bias, patch_size, *,
                compute_dtype=jnp.bfloat16,
                out_dtype=None,
                tm_target=1024,
                vmem_budget_bytes=24 * 1024 * 1024):
    """ViT patch embedding: Conv2d(kernel=stride=patch) -> flatten(2) -> transpose(1,2).

    x: (B, C, H, W) NCHW.  weight: (embed_dim, C, ph, pw).  bias: (embed_dim,).
    Returns (B, num_patches, embed_dim) in `out_dtype` (default: x.dtype).
    Note: compute_dtype=bf16 (default) trades a small accuracy loss for speed;
    pass compute_dtype=jnp.float32 for exact parity with the f32 Conv2d.
    """
    B, C, H, W = x.shape
    ph, pw = patch_size
    assert H % ph == 0 and W % pw == 0, "image size must match model"
    gh, gw = H // ph, W // pw
    embed_dim = weight.shape[0]
    out_dtype = x.dtype if out_dtype is None else out_dtype

    M = B * gh * gw                 # rows = total patches
    K = C * ph * pw                 # contraction dim
    N = embed_dim

    # Lane-dense padding of K / N up to multiples of 128.
    K_pad = _round_up(K, 128)
    N_pad = _round_up(N, 128)

    itemsize = jnp.dtype(compute_dtype).itemsize
    out_itemsize = jnp.dtype(out_dtype).itemsize
    min_tile = 16 if itemsize <= 2 else 8          # bf16 min sublane tile is 16

    # --- row-tile selection: occupancy-aware + MXU-aligned ------------------
    # Aim for >= ~8 grid steps (>= 4 per TensorCore on v7x), cap at tm_target,
    # round to 256 (full MXU) when the tile is large, else to min_tile.
    tm = min(tm_target, max(min_tile, pl.cdiv(M, 8)))
    tm = _round_up(tm, 256 if tm >= 128 else min_tile)
    tm = min(tm, _round_up(M, min_tile))

    def footprint(t):
        # BlockSpec double-buffers every operand (weight/bias too, even though
        # their block index never changes and they aren't re-DMA'd).
        return (2 * t * K_pad * itemsize            # patch tile
                + 2 * t * N_pad * out_itemsize      # output tile
                + 2 * K_pad * N_pad * itemsize      # weight
                + 2 * N_pad * 4)                    # bias (f32)

    while tm > min_tile and footprint(tm) > vmem_budget_bytes:
        tm = max(min_tile, _round_up(tm // 2, min_tile))
    if footprint(tm) > vmem_budget_bytes:
        # TODO(synk): add an N "parallel" grid axis (and a K "arbitrary" axis
        # with an f32 VMEM accumulator + pl.when init/finalize) for very large
        # embed_dim instead of requiring the whole weight to fit in VMEM.
        raise NotImplementedError(
            "PatchEmbed projection weight does not fit in VMEM with a single "
            f"N tile (K_pad={K_pad}, N_pad={N_pad}); embed_dim too large for "
            "this kernel variant.")

    grid_m = pl.cdiv(M, tm)         # ragged last tile handled by Pallas masking

    # --- im2col + cast + pad: one fused XLA pass over x under jit -----------
    # TODO(synk): fuse this rearrange into the kernel's input DMA to read x
    # exactly once (see header note).
    patches = (
        x.reshape(B, C, gh, ph, gw, pw)
        .transpose(0, 2, 4, 1, 3, 5)              # (B, gh, gw, C, ph, pw)
        .reshape(M, K)
        .astype(compute_dtype)
    )
    if K_pad != K:
        patches = jnp.pad(patches, ((0, 0), (0, K_pad - K)))

    w2 = weight.reshape(N, K).T.astype(compute_dtype)   # (K, N)
    if (K_pad, N_pad) != (K, N):
        w2 = jnp.pad(w2, ((0, K_pad - K), (0, N_pad - N)))
    b2 = bias.astype(jnp.float32).reshape(1, N)
    if N_pad != N:
        b2 = jnp.pad(b2, ((0, 0), (0, N_pad - N)))

    cost = pl.CostEstimate(
        flops=2 * M * K_pad * N_pad,
        transcendentals=0,
        bytes_accessed=(M * K_pad * itemsize + K_pad * N_pad * itemsize
                        + M * N_pad * out_itemsize + N_pad * 4),
    )

    # Right-size the VMEM limit from the real footprint; clamp so it is safe
    # on v7x (64 MiB physical) yet never below the 32 MiB default.
    vmem_limit_bytes = int(min(max(2 * footprint(tm), 32 << 20), 48 << 20))

    out = pl.pallas_call(
        _patch_embed_kernel,
        out_shape=jax.ShapeDtypeStruct((M, N_pad), out_dtype),
        grid=(grid_m,),
        in_specs=[
            pl.BlockSpec((tm, K_pad), lambda i: (i, 0)),      # patch row tile
            pl.BlockSpec((K_pad, N_pad), lambda i: (0, 0)),   # weight (VMEM-resident)
            pl.BlockSpec((1, N_pad), lambda i: (0, 0)),       # f32 bias
        ],
        out_specs=pl.BlockSpec((tm, N_pad), lambda i: (i, 0)),
        compiler_params=pltpu.CompilerParams(
            dimension_semantics=("parallel",),                 # megacore / v7x 2-TC
            vmem_limit_bytes=vmem_limit_bytes,
        ),
        cost_estimate=cost,
    )(patches, w2, b2)

    # (M, N_pad) -> (B, num_patches, embed_dim); slice is a no-op when N_pad == N.
    return out[:, :N].reshape(B, gh * gw, embed_dim)


if __name__ == "__main__":
    # Small shapes consistent with the module: img_size=16, patch_size=4,
    # in_c=4, embed_dim=32, batch=2  ->  num_patches = (16/4)^2 = 16.
    B, C, H, W = 2, 4, 16, 16
    patch = (4, 4)
    embed_dim = 32

    key = jax.random.PRNGKey(0)
    kx, kw, kb = jax.random.split(key, 3)
    x = jax.random.normal(kx, (B, C, H, W), dtype=jnp.float32)
    weight = jax.random.normal(kw, (embed_dim, C, patch[0], patch[1]),
                               dtype=jnp.float32) * 0.02
    bias = jax.random.normal(kb, (embed_dim,), dtype=jnp.float32) * 0.02

    gh, gw = H // patch[0], W // patch[1]

    # Reference: plain-JAX conv-as-matmul (identical math to nn.Conv2d with
    # kernel_size == stride == patch_size), f32 end to end.
    patches_ref = (
        x.reshape(B, C, gh, patch[0], gw, patch[1])
        .transpose(0, 2, 4, 1, 3, 5)
        .reshape(B * gh * gw, C * patch[0] * patch[1])
    )
    ref = (patches_ref @ weight.reshape(embed_dim, -1).T + bias).reshape(
        B, gh * gw, embed_dim)

    # Default bf16-operand / f32-accumulate path (loosened tolerance for bf16).
    out_bf16 = jax.block_until_ready(patch_embed(x, weight, bias, patch_size=patch))
    assert out_bf16.shape == (B, gh * gw, embed_dim)
    assert jnp.allclose(out_bf16, ref, atol=5e-2, rtol=5e-2), (
        float(jnp.max(jnp.abs(out_bf16 - ref))))

    # Full-f32 path matches the PyTorch module tightly.
    out_f32 = jax.block_until_ready(
        patch_embed(x, weight, bias, patch_size=patch, compute_dtype=jnp.float32))
    assert out_f32.shape == (B, gh * gw, embed_dim)
    assert jnp.allclose(out_f32, ref, atol=1e-4, rtol=1e-4), (
        float(jnp.max(jnp.abs(out_f32 - ref))))

    # bf16 output option (for bf16 downstream consumers on mem-bound chips).
    out_bf16_out = jax.block_until_ready(
        patch_embed(x, weight, bias, patch_size=patch, out_dtype=jnp.bfloat16))
    assert out_bf16_out.shape == (B, gh * gw, embed_dim)
    assert out_bf16_out.dtype == jnp.bfloat16

    print("KERNEL_OK")
</pallas_src>

<mosaic_0001>
module attributes {stable_mosaic.version = 11 : i64} {
  func.func @_patch_embed_kernel(%arg0: i32, %arg1: memref<16x128xbf16, #tpu.memory_space<vmem>>, %arg2: memref<128x128xbf16, #tpu.memory_space<vmem>>, %arg3: memref<1x128xf32, #tpu.memory_space<vmem>>, %arg4: memref<16x128xf32, #tpu.memory_space<vmem>>) attributes {dimension_semantics = [#tpu.dimension_semantics<parallel>], iteration_bounds = array<i64: 2>, scalar_prefetch = 0 : i64, scratch_operands = 0 : i64, tpu.core_type = #tpu.core_type<tc>, window_params = [{transform_indices = @transform_0, window_bounds = array<i64: 16, 128>}, {pipeline_mode = #tpu.pipeline_mode<synchronous>, transform_indices = @transform_1, window_bounds = array<i64: 128, 128>}, {pipeline_mode = #tpu.pipeline_mode<synchronous>, transform_indices = @transform_2, window_bounds = array<i64: 1, 128>}, {transform_indices = @transform_3, window_bounds = array<i64: 16, 128>}]} {
    %c0 = arith.constant 0 : index
    %c0_0 = arith.constant 0 : index
    %0 = vector.load %arg1[%c0, %c0_0] : memref<16x128xbf16, #tpu.memory_space<vmem>>, vector<16x128xbf16>
    %c0_1 = arith.constant 0 : index
    %c0_2 = arith.constant 0 : index
    %1 = vector.load %arg2[%c0_1, %c0_2] : memref<128x128xbf16, #tpu.memory_space<vmem>>, vector<128x128xbf16>
    %cst = arith.constant dense<0.000000e+00> : vector<16x128xf32>
    %2 = tpu.matmul %0, %1, %cst {dimension_numbers = #tpu.dot_dimension_numbers<[1], [0], [0], [1], [0, 0, 1, 1], [], []>} : vector<16x128xbf16>, vector<128x128xbf16>, vector<16x128xf32> -> vector<16x128xf32>
    %c0_3 = arith.constant 0 : index
    %c0_4 = arith.constant 0 : index
    %3 = vector.load %arg3[%c0_3, %c0_4] : memref<1x128xf32, #tpu.memory_space<vmem>>, vector<1x128xf32>
    %4 = vector.broadcast %3 : vector<1x128xf32> to vector<16x128xf32>
    %5 = arith.addf %2, %4 : vector<16x128xf32>
    %c0_5 = arith.constant 0 : index
    %c0_6 = arith.constant 0 : index
    %6 = vector.load %arg4[%c0_5, %c0_6] : memref<16x128xf32, #tpu.memory_space<vmem>>, vector<16x128xf32>
    tpu.vector_store %arg4[%c0_5, %c0_6], %5 {strides = array<i32>} : memref<16x128xf32, #tpu.memory_space<vmem>>, vector<16x128xf32>,
    return
  }
  func.func @transform_0(%arg0: i32) -> (i32, i32) {
    %c0_i32 = arith.constant 0 : i32
    %c0_i32_0 = arith.constant 0 : i32
    return %arg0, %c0_i32 : i32, i32
  }
  func.func @transform_1(%arg0: i32) -> (i32, i32) {
    %c0_i32 = arith.constant 0 : i32
    %c0_i32_0 = arith.constant 0 : i32
    %c0_i32_1 = arith.constant 0 : i32
    return %c0_i32, %c0_i32_0 : i32, i32
  }
  func.func @transform_2(%arg0: i32) -> (i32, i32) {
    %c0_i32 = arith.constant 0 : i32
    %c0_i32_0 = arith.constant 0 : i32
    %c0_i32_1 = arith.constant 0 : i32
    return %c0_i32, %c0_i32_0 : i32, i32
  }
  func.func @transform_3(%arg0: i32) -> (i32, i32) {
    %c0_i32 = arith.constant 0 : i32
    %c0_i32_0 = arith.constant 0 : i32
    return %arg0, %c0_i32 : i32, i32
  }
}

</mosaic_0001>

<bundles_post_ra>
// kernel: patch_embed.1
= control target key start
LH: loop header
LB: loop body
LE: loop exit
PB: predicated region body
PF: predicated region fallthrough
CT: control target
= control target key end

     0   :  { %8 = vsyncpa [#allocation3], 0  ;;  %s690_s0 = inlined_call_operand.vmem [shape: bf16[32,128], index: 0, kind: input, shape index: {}]   ;;  %s691_s1 = inlined_call_operand.vmem [shape: bf16[128,128], index: 1, kind: input, shape index: {}]   ;;  %s692_s2 = inlined_call_operand.vmem [shape: f32[1,128], index: 2, kind: input, shape index: {}]   ;;  %s693_s3 = inlined_call_operand.hbm [shape: f32[32,128], index: 3, kind: output, shape index: {}]  }
   0x1   :  { %10 = vsyncpa [#allocation3 + $0x1], 0  ;;  %s562_s12 = smov 0   ;;  %s564_s13 = smov 0  }
   0x2   :  { %s566_s14 = smov 0   ;;  %s568_s15 = smov 0  }
   0x3 LB: > { %s583_s16 = sadd.s32 4294967295, %s535_s15   ;;  %s371_s17 = sadd.s32 4294967294, %s535_s15   ;;  %s535_s15 = sphi %s568_s15, %s699_s15   ;;  %s531_s14 = sphi %s566_s14, %s698_s14   ;;  %s527_s13 = sphi %s564_s13, %s697_s13   ;;  %s523_s12 = sphi %s562_s12, %s696_s12  }
   0x4   : > { %s587_s18 = sadd.s32 1, %s535_s15   ;;  %s91_s19 = sadd.s32 1, %s531_s14 }
   0x5   : > { %s88_s20 = ssub.s32 %s535_s15, %s587_s18  ;;  %p101_p0 = scmp.ne.s32.totalorder %s531_s14, %s527_s13 }
   0x6   : > { %p89_p1 = scmp.eq.s32.totalorder %s88_s20, 0  ;;  %p102_p2 = scmp.eq.s32.totalorder %s583_s16, 1 }
   0x7   : > { %p107_p3 = scmp.ne.s32.totalorder %s527_s13, %s523_s12  ;;  %p108_p4 = scmp.eq.s32.totalorder %s371_s17, 1 }
   0x8   : > { %s598_s21 = scalar_select %p89_p1, %s531_s14, %s91_s19  }
   0x9   : > { %p600_p5 = por %p102_p2, %p101_p0  ;;  %p604_p6 = por %p108_p4, %p107_p3 }
   0xa   : > { %p374_p7 = scmp.ge.s32.totalorder %s535_s15, 1  ;;  %p141_p8 = scmp.lt.s32.totalorder %s535_s15, 3 }
   0xc   : > { %p142_p9 = pnand %p374_p7, %p141_p8 }
   0xd   : > { %s376_s28 = sshll.u32 (!%p142_p9), %s583_s16, 1  ;;  %s162_s27 = sand.u32 (!%p142_p9), 1, %s527_s13  }
   0xe   : > { %145 = sbr.rel (%p142_p9) target bundleno = 265 (0x109), region = 32  ;;  %p166_p10 = scmp.lt.s32.totalorder (!%p142_p9), %s376_s28, 3 }
   0xf   : > { %s393_s6 = sshll.u32 (!%p142_p9), %s583_s16, 8  ;;  %s650_s10 = scalar_lea.sflag (!%p142_p9), [#allocation3], %s162_s27 }
  0x10   : > { %s648_s9 = scalar_lea.hbm (!%p142_p9), %s693_s3, %s393_s6  ;;  %s539_s16 = smov (!%p142_p9), [#allocation2]  }
  0x11   : > { %s479_s17 = sshll.u32 (!%p142_p9), %s539_s16, 4  ;;  %s480_s17 = int_to_ptr.vmem [resolvable:$false] %s479_s17 }
  0x12   : > { %s481_s19 = scalar_lea.vmem (!%p142_p9), %s480_s17, 512 }
  0x13   : > { %v466_v0 = vld [vmem:[%s691_s1 + $0x38] sm:$0xff]   ;;  %v537_v1 = vmov 0.0   ;;  %v467_v2 = vld [vmem:[%s691_s1 + $0x30] sm:$0xff]   ;;  %vm538_vm0 = vmmov 0   ;;  %s701_s28 = smov (!%p166_p10, %s376_s28), 3  ;;  %v468_v3 = vld [vmem:[%s691_s1 + $0x28] sm:$0xff]  }
  0x14   : > { %403 = vmatprep.subr.bf16.mxu0 %v537_v1  ;;  %419 = vmatprep.mubr.msk.bf16.mxu0 %vm538_vm0, %v537_v1  ;;  %s377_s4 = sshll.u32 %s701_s28, 2  ;;  %v469_v4 = vld [vmem:[%s691_s1 + $0x20] sm:$0xff]   ;;  %v470_v5 = vld [vmem:[%s691_s1 + $0x18] sm:$0xff]   ;;  %v471_v6 = vld [vmem:[%s691_s1 + $0x10] sm:$0xff]   ;;  %s375_s28 = sshll.u32 %s162_s27, 4 }
  0x15   : > { %404 = vmatpush3.bf16.msra.mxu0 %v466_v0  ;;  %s169_s7 = scalar_lea.vmem %s690_s0, %s377_s4  ;;  %v472_v7 = vld [vmem:[%s691_s1 + $0x8] sm:$0xff]   ;;  %v473_v8 = vld [vmem:[%s691_s1] sm:$0xff]   ;;  %s164_s4 = scalar_lea.vmem [#allocation2], %s375_s28 }
  0x16   : > { %405 = vmatprep.subr.bf16.mxu0 %v537_v1  ;;  %v474_v9 = vld [vmem:[%s169_s7] sm:$0xff]   ;;  %s309_s5 = sshll.u32 %s164_s4, 4  ;;  %s643_s5 = int_to_ptr.vmem [resolvable:$true] %s309_s5 }
  0x17   : > { %v378_v10 = vld [vmem:[%s692_s2] ss:$0 sm:$0xff]  ;;  %s475_s11 = scalar_lea.vmem %s643_s5, 256  ;;  %p482_p0 = scmp.lt.s32.totalorder %s643_s5, %s480_s17 }
  0x18   : > { %p476_p11 = scmp.ne.s32.totalorder %s643_s5, %s475_s11  ;;  %p483_p1 = scmp.lt.s32.totalorder %s481_s19, %s475_s11 }
  0x19   : > { %406 = vmatpush3.bf16.msra.mxu0 %v467_v2 }
  0x1a   : > { %407 = vmatprep.subr.bf16.mxu0 %v537_v1  ;;  %p477_p12 = pnand %p476_p11, %p600_p5  ;;  %p484_p2 = por %p483_p1, %p482_p0 }
  0x1c   : > { %p478_p13 = pneg %p477_p12 }
  0x1d   : > { %408 = vmatpush3.bf16.msra.mxu0 %v468_v3 }
  0x1e   : > { %409 = vmatprep.subr.bf16.mxu0 %v537_v1  ;;  %p485_p3 = pnand %p484_p2, %p478_p13 }
  0x21   : > { %410 = vmatpush3.bf16.msra.mxu0 %v469_v4 }
  0x22   : > { %411 = vmatprep.subr.bf16.mxu0 %v537_v1 }
  0x25   : > { %412 = vmatpush3.bf16.msra.mxu0 %v470_v5 }
  0x26   : > { %413 = vmatprep.subr.bf16.mxu0 %v537_v1 }
  0x29   : > { %414 = vmatpush3.bf16.msra.mxu0 %v471_v6 }
  0x2a   : > { %415 = vmatprep.subr.bf16.mxu0 %v537_v1 }
  0x2d   : > { %416 = vmatpush3.bf16.msra.mxu0 %v472_v7 }
  0x2e   : > { %417 = vmatprep.subr.bf16.mxu0 %v537_v1 }
  0x31   : > { %418 = vmatpush3.bf16.msra.mxu0 %v473_v8 }
  0x34   : > { %420 = vmatmul.mubr.bf16.vlgmr.msra.gmra.mxu0 %v474_v9 }
  0xf4   : > { %v286_v11 = vpop.f32.mrf.mxu0 }
  0xf5   : > { %v287_v12 = vadd.f32 %v378_v10, %v286_v11 }
  0xf6   : > { %v421_v13 = vpop.f32.mrf.mxu0 }
  0xf7   : > { %293 = vst [vmem:[%s164_s4] sm:$0xff] %v287_v12 }
  0xf8   : > { %v289_v14 = vpop.f32.mrf.mxu0 }
  0xf9   : > { %v290_v15 = vadd.f32 %v378_v10, %v289_v14 }
  0xfa   : > { %v422_v16 = vpop.f32.mrf.mxu0 }
  0xfb   : > { %294 = vst [vmem:[%s164_s4 + $0x8] sm:$0xff] %v290_v15 }
  0xfc   : > { %488 = shalt.err (!%p485_p3)
}
  0xfd   : > { %s489_s20 = scalar_lea.hbm %s648_s9, 256  ;;  %s493_s26 = scalar_lea.hbm %s693_s3, 512 }
  0xfe   : > { %p490_p4 = scmp.ne.s32.totalorder %s648_s9, %s489_s20  ;;  %p494_p9 = scmp.lt.s32.totalorder %s648_s9, %s693_s3 }
  0xff   : > { %p495_p10 = scmp.lt.s32.totalorder %s493_s26, %s489_s20 }
 0x100   : > { %p491_p7 = pnand %p490_p4, %p600_p5 }
 0x101   : > { %p496_p11 = por %p495_p10, %p494_p9 }
 0x102   : > { %p492_p8 = pneg %p491_p7 }
 0x104   : > { %p497_p12 = pnand %p496_p11, %p492_p8 }
 0x106   : > { %500 = shalt.err (!%p497_p12)
}
 0x107   : > { %s540_s29 = smov 128   ;;  %s541_s30 = smov 8  }
 0x108   : > { %423 = dma.vmem_to_hbm [thread:$0]  (%p600_p5), %s643_s5, 256, %s648_s9, %s650_s10, %s540_s29, %s540_s29, %s541_s30  }
 0x109 PF: > { %p429_p13 = scmp.ge.s32.totalorder %s535_s15, 2  ;;  %s324_s4 = sand.u32 1, %s523_s12  }
 0x10a   : > { %s325_s6 = scalar_lea.sflag [#allocation3], %s324_s4 }
 0x10b   : > { %p426_p0 = pnand %p429_p13, %p604_p6 }
 0x10d   : > { %p427_p1 = pneg %p426_p0 }
 0x10f   : > { %518 = dma.done.wait (%p427_p1), %s325_s6, 256  }
 0x110   : > { %520 = vsyncadd (%p427_p1), %s325_s6, 4294967040  ;;  %p13_p2 = scmp.ge.s32.totalorder %s587_s18, 4   ;;  %s696_s12 = smov %s527_s13 }
 0x111   : > { %s697_s13 = smov %s531_s14  ;;  %s698_s14 = smov %s598_s21 }
 0x112   : > { %s699_s15 = smov %s587_s18  ;;  %15 = sbr.rel (!%p13_p2) target bundleno = 3 (0x3), region = 67 }
 0x117   :  { %330 = vsyncpa [#allocation3], 1 }
 0x118   :  { %332 = vsyncpa [#allocation3 + $0x1], 1 }

</bundles_post_ra>
